<compile_context>
chip_gen: v5e
topology: v5e:2x2
jax: 0.10.0
libtpu: 0.0.40
codegen_flags: <defaults>
</compile_context>

<pallas_src>
import numpy as np
import jax
import jax.numpy as jnp
from jax import lax
from jax.experimental import pallas as pl
from jax.experimental.pallas import tpu as pltpu

_LANE = 128   # lanes per vreg (batch axis)
_STRIP = 8    # sublanes per strip -> one full (8, 128) f32 vreg per feature read


# ----------------------------------------------------------------------------
# Pallas kernel: one (13|7, ROWS, 128) state tile -> one (4, ROWS, 128) cmd tile
# ----------------------------------------------------------------------------
def _lee_kernel(params_ref, rs_ref, ct_ref, cmd_ref):
    # params_ref : SMEM (31,) f32
    #   [0:3] pos_gain, [3:6] vel_gain, [6:9] g, [9:12] attitude_gain,
    #   [12:15] ang_rate_gain,
    #   [15:31] mixer_scaled (row-major 4x4) = diag(2/max_thrusts) @ mixer,
    #           with the thrust column (col 3) pre-multiplied by mass.
    # rs_ref  : VMEM (13, ROWS, 128) f32   root_state, feature-major
    # ct_ref  : VMEM (7,  ROWS, 128) f32   control_target, feature-major
    # cmd_ref : VMEM (4,  ROWS, 128) f32

    # ---- hoist every SMEM scalar read once, ahead of the strip loop ---------
    kpx, kpy, kpz = params_ref[0], params_ref[1], params_ref[2]
    kvx, kvy, kvz = params_ref[3], params_ref[4], params_ref[5]
    gx, gy, gz = params_ref[6], params_ref[7], params_ref[8]
    kax, kay, kaz = params_ref[9], params_ref[10], params_ref[11]
    krx, kry, krz = params_ref[12], params_ref[13], params_ref[14]
    mix = [params_ref[15 + i] for i in range(16)]

    n_strips = rs_ref.shape[1] // _STRIP

    # Strip-mined over 8-sublane chunks: every load/store below is a full,
    # aligned (8,128) vreg (unmasked vld/vst); strips are fully independent so
    # only one strip's intermediates are live at a time.  Static slices keep
    # addressing constant-folded (no dynamic sublane indexing).
    for s in range(n_strips):
        sl = slice(s * _STRIP, (s + 1) * _STRIP)

        px, py, pz = rs_ref[0, sl, :], rs_ref[1, sl, :], rs_ref[2, sl, :]
        qw, qx, qy, qz = (rs_ref[3, sl, :], rs_ref[4, sl, :],
                          rs_ref[5, sl, :], rs_ref[6, sl, :])
        vx, vy, vz = rs_ref[7, sl, :], rs_ref[8, sl, :], rs_ref[9, sl, :]
        wx, wy, wz = rs_ref[10, sl, :], rs_ref[11, sl, :], rs_ref[12, sl, :]
        tpx, tpy, tpz = ct_ref[0, sl, :], ct_ref[1, sl, :], ct_ref[2, sl, :]
        tvx, tvy, tvz = ct_ref[3, sl, :], ct_ref[4, sl, :], ct_ref[5, sl, :]
        tyaw = ct_ref[6, sl, :]

        # ---- desired acceleration -------------------------------------------
        ax = (tpx - px) * kpx + (tvx - vx) * kvx + gx
        ay = (tpy - py) * kpy + (tvy - vy) * kvy + gy
        az = (tpz - pz) * kpz + (tvz - vz) * kvz + gz

        # ---- quaternion (w, x, y, z) -> rotation matrix R --------------------
        r00 = 1.0 - 2.0 * (qy * qy + qz * qz)
        r01 = 2.0 * (qx * qy - qw * qz)
        r02 = 2.0 * (qx * qz + qw * qy)
        r10 = 2.0 * (qx * qy + qw * qz)
        r11 = 1.0 - 2.0 * (qx * qx + qz * qz)
        r12 = 2.0 * (qy * qz - qw * qx)
        r20 = 2.0 * (qx * qz - qw * qy)
        r21 = 2.0 * (qy * qz + qw * qx)
        r22 = 1.0 - 2.0 * (qx * qx + qy * qy)

        # ---- desired body axes (b1z == 0) -------------------------------------
        b1x = jnp.cos(tyaw)
        b1y = jnp.sin(tyaw)

        inv_acc = lax.rsqrt(ax * ax + ay * ay + az * az)   # matches torch (no eps)
        b3x, b3y, b3z = ax * inv_acc, ay * inv_acc, az * inv_acc

        # b2 = normalize(cross(b3, b1)), eps-guarded like F.normalize (eps=1e-12)
        cx = -b3z * b1y
        cy = b3z * b1x
        cz = b3x * b1y - b3y * b1x
        inv_cn = lax.rsqrt(jnp.maximum(cx * cx + cy * cy + cz * cz, 1e-24))
        b2x, b2y, b2z = cx * inv_cn, cy * inv_cn, cz * inv_cn

        # ---- attitude error: 0.5 * (R_des^T R - R^T R_des), 3 entries ---------
        m21 = b3x * r01 + b3y * r11 + b3z * r21
        m12 = b2x * r02 + b2y * r12 + b2z * r22
        m02 = b1x * r02 + b1y * r12                    # b1z == 0
        m20 = b3x * r00 + b3y * r10 + b3z * r20
        m10 = b2x * r00 + b2y * r10 + b2z * r20
        m01 = b1x * r01 + b1y * r11                    # b1z == 0

        ex = 0.5 * (m21 - m12)
        ey = 0.5 * (m02 - m20)
        ez = 0.5 * (m10 - m01)

        # torch.cross(ang_vel, ang_vel) == 0 in the reference module, dropped.
        aax = -ex * kax - wx * krx
        aay = -ey * kay - wy * kry
        aaz = -ez * kaz - wz * krz

        # mass is folded into the mixer thrust column -> plain dot with R[:, 2]
        thrust = ax * r02 + ay * r12 + az * r22

        # ---- pre-scaled mixer mat-vec: 16 scalar*vector FMAs, then "- 1" ------
        for i in range(4):
            ci = (mix[4 * i + 0] * aax + mix[4 * i + 1] * aay
                  + mix[4 * i + 2] * aaz + mix[4 * i + 3] * thrust) - 1.0
            cmd_ref[i, sl, :] = ci.astype(cmd_ref.dtype)   # full (8,128) slab store


# ----------------------------------------------------------------------------
# Parameter construction (deterministic, mirrors LeePositionController.__init__)
# ----------------------------------------------------------------------------
def build_lee_params(g=9.81):
    mass = 0.716
    inertia = {"xx": 0.007, "yy": 0.007, "zz": 0.012}
    rotor_angles = np.array([0.0, np.pi / 2, np.pi, 3 * np.pi / 2])
    arm_lengths = np.full(4, 0.17)
    force_constants = np.full(4, 8.54858e-6)
    moment_constants = np.full(4, 1.3677728e-7)
    directions = np.array([1.0, -1.0, 1.0, -1.0])
    max_rot_vel = np.full(4, 838.0)

    max_thrusts = np.square(max_rot_vel) * force_constants
    A = np.stack([
        np.sin(rotor_angles) * arm_lengths,
        -np.cos(rotor_angles) * arm_lengths,
        -directions * moment_constants / force_constants,
        np.ones_like(rotor_angles),
    ])                                                               # (4, nr)
    I4 = np.diag([inertia["xx"], inertia["yy"], inertia["zz"], 1.0])
    mixer = A.T @ np.linalg.inv(A @ A.T) @ I4                        # (nr, 4)
    attitude_gain = np.array([3.0, 3.0, 0.15]) @ np.linalg.inv(I4[:3, :3])
    ang_rate_gain = np.array([0.52, 0.52, 0.18]) @ np.linalg.inv(I4[:3, :3])

    p = {
        "pos_gain": np.array([6.0, 6.0, 6.0]),
        "vel_gain": np.array([4.7, 4.7, 4.7]),
        "g": np.abs(np.array([0.0, 0.0, g])),
        "attitude_gain": attitude_gain,
        "ang_rate_gain": ang_rate_gain,
        "mass": np.array(mass),
        "mixer": mixer,
        "max_thrusts": max_thrusts,
    }
    return {k: jnp.asarray(v, dtype=jnp.float32) for k, v in p.items()}


# ----------------------------------------------------------------------------
# Wrapper: feature-major layout, tile sizing, pallas_call
# ----------------------------------------------------------------------------
def lee_position_controller(root_state, control_target, controller_state, params,
                            block_rows=32):
    """block_rows * 128 = batch elements per grid step (default 4096)."""
    root_state = jnp.asarray(root_state, jnp.float32)
    control_target = jnp.asarray(control_target, jnp.float32)

    single = root_state.ndim == 1
    if single:
        root_state = root_state[None, :]
        control_target = control_target[None, :]
    B = root_state.shape[0]

    # Tile sizing: 8-sublane-aligned rows of 128 lanes; shrink tile for tiny B.
    needed_rows = -(-B // _LANE)
    if needed_rows < block_rows:
        rows_per_tile = ((needed_rows + _STRIP - 1) // _STRIP) * _STRIP
    else:
        rows_per_tile = block_rows
    total_rows = -(-needed_rows // rows_per_tile) * rows_per_tile
    b_pad = total_rows * _LANE
    n_tiles = total_rows // rows_per_tile

    # Pad the batch axis only (no concat of the two inputs -> one copy each),
    # then transpose to feature-major and do a free row-major reshape to
    # (feat, rows, 128).
    pad = b_pad - B
    rs = root_state if pad == 0 else jnp.pad(root_state, ((0, pad), (0, 0)))
    ct = control_target if pad == 0 else jnp.pad(control_target, ((0, pad), (0, 0)))
    rs = rs.T.reshape(13, total_rows, _LANE)
    ct = ct.T.reshape(7, total_rows, _LANE)

    # One packed SMEM scalar table: gains, g, and the mixer with the output
    # scaling (2 / max_thrusts) and the mass (thrust column) folded in.
    mixer_scaled = (2.0 / params["max_thrusts"])[:, None] * params["mixer"]   # (4,4)
    mixer_scaled = mixer_scaled.at[:, 3].multiply(params["mass"])
    packed = jnp.concatenate([
        params["pos_gain"], params["vel_gain"], params["g"],
        params["attitude_gain"], params["ang_rate_gain"],
        mixer_scaled.reshape(-1),
    ]).astype(jnp.float32)                                                    # (31,)

    cmd = pl.pallas_call(
        _lee_kernel,
        out_shape=jax.ShapeDtypeStruct((4, total_rows, _LANE), jnp.float32),
        grid=(n_tiles,),
        in_specs=[
            pl.BlockSpec(memory_space=pltpu.MemorySpace.SMEM),                # params
            pl.BlockSpec((13, rows_per_tile, _LANE), lambda b: (0, b, 0)),    # root_state
            pl.BlockSpec((7, rows_per_tile, _LANE), lambda b: (0, b, 0)),     # target
        ],
        out_specs=pl.BlockSpec((4, rows_per_tile, _LANE), lambda b: (0, b, 0)),
        compiler_params=pltpu.CompilerParams(
            dimension_semantics=("parallel",)),
        cost_estimate=pl.CostEstimate(
            flops=150 * b_pad,
            transcendentals=4 * b_pad,
            bytes_accessed=(13 + 7 + 4) * 4 * b_pad),
    )(packed, rs, ct)

    cmd = cmd.reshape(4, b_pad)[:, :B].T                                      # (B, 4)
    if single:
        cmd = cmd[0]
    # TODO(synk): TensorDict controller_state has no Pallas equivalent; it is
    # passed through unchanged as a plain pytree (the torch module never uses it).
    return cmd, controller_state


# ----------------------------------------------------------------------------
# Pure-JAX reference (mirrors the torch forward, single sample) for verification
# ----------------------------------------------------------------------------
def _reference(root_state, control_target, p):
    pos, rot, vel, ang_vel = (root_state[0:3], root_state[3:7],
                              root_state[7:10], root_state[10:13])
    target_pos, target_vel, target_yaw = (control_target[0:3],
                                          control_target[3:6],
                                          control_target[6:7])
    acc = ((target_pos - pos) * p["pos_gain"]
           + (target_vel - vel) * p["vel_gain"] + p["g"])
    w, x, y, z = rot
    R = jnp.array([
        [1 - 2 * (y * y + z * z), 2 * (x * y - w * z), 2 * (x * z + w * y)],
        [2 * (x * y + w * z), 1 - 2 * (x * x + z * z), 2 * (y * z - w * x)],
        [2 * (x * z - w * y), 2 * (y * z + w * x), 1 - 2 * (x * x + y * y)],
    ])
    b1 = jnp.concatenate([jnp.cos(target_yaw), jnp.sin(target_yaw),
                          jnp.zeros_like(target_yaw)])
    b3 = acc / jnp.linalg.norm(acc)
    c = jnp.cross(b3, b1)
    b2 = c / jnp.maximum(jnp.linalg.norm(c), 1e-12)
    R_des = jnp.stack([b1, b2, b3], axis=-1)
    E = 0.5 * (R_des.T @ R - R.T @ R_des)
    ang_error = jnp.stack([E[2, 1], E[0, 2], E[1, 0]])
    ang_acc = (-ang_error * p["attitude_gain"]
               - ang_vel * p["ang_rate_gain"]
               + jnp.cross(ang_vel, ang_vel))
    thrust = (p["mass"] * (acc @ R[:, 2]))[None]
    cmd = p["mixer"] @ jnp.concatenate([ang_acc, thrust])
    return cmd / p["max_thrusts"] * 2.0 - 1.0


if __name__ == "__main__":
    params = build_lee_params(g=9.81)
    key = jax.random.PRNGKey(0)

    def make_inputs(k, B):
        k1, k2 = jax.random.split(k)
        rs = jax.random.normal(k1, (B, 13), dtype=jnp.float32)
        quat = rs[:, 3:7]
        quat = quat / jnp.linalg.norm(quat, axis=-1, keepdims=True)
        rs = rs.at[:, 3:7].set(quat)
        ct = jax.random.normal(k2, (B, 7), dtype=jnp.float32)
        return rs, ct

    ref_fn = jax.vmap(lambda r, c: _reference(r, c, params))
    k_small, k_large = jax.random.split(key)

    # Small batch of environments (single tile, single strip).
    rs8, ct8 = make_inputs(k_small, 8)
    cmd8, _ = lee_position_controller(rs8, ct8, {}, params)
    cmd8 = jax.block_until_ready(cmd8)
    ref8 = ref_fn(rs8, ct8)
    if not np.allclose(np.asarray(cmd8), np.asarray(ref8), rtol=1e-3, atol=1e-3):
        raise AssertionError(f"small-batch mismatch:\nkernel={cmd8}\nref={ref8}")

    # Larger batch: exercises multiple strips per tile, ragged padding and a
    # >1 grid (two "parallel" tiles -> both v7x TensorCores).
    rsL, ctL = make_inputs(k_large, 5000)
    cmdL, _ = lee_position_controller(rsL, ctL, {}, params)
    cmdL = jax.block_until_ready(cmdL)
    refL = ref_fn(rsL, ctL)
    if not np.allclose(np.asarray(cmdL), np.asarray(refL), rtol=1e-3, atol=1e-3):
        bad = np.max(np.abs(np.asarray(cmdL) - np.asarray(refL)))
        raise AssertionError(f"large-batch mismatch, max abs err {bad}")

    # Single-sample call (original module semantics: 1-D inputs, 1-D output).
    cmd1, _ = lee_position_controller(rs8[0], ct8[0], {}, params)
    cmd1 = jax.block_until_ready(cmd1)
    ref1 = _reference(rs8[0], ct8[0], params)
    if not np.allclose(np.asarray(cmd1), np.asarray(ref1), rtol=1e-3, atol=1e-3):
        raise AssertionError(f"single mismatch: kernel={cmd1} ref={ref1}")

    print("KERNEL_OK")
</pallas_src>

<mosaic_0001>
module attributes {stable_mosaic.version = 11 : i64} {
  func.func @_lee_kernel(%arg0: i32, %arg1: memref<31xf32, #tpu.memory_space<smem>>, %arg2: memref<13x8x128xf32, #tpu.memory_space<vmem>>, %arg3: memref<7x8x128xf32, #tpu.memory_space<vmem>>, %arg4: memref<4x8x128xf32, #tpu.memory_space<vmem>>) attributes {dimension_semantics = [#tpu.dimension_semantics<parallel>], iteration_bounds = array<i64: 1>, scalar_prefetch = 0 : i64, scratch_operands = 0 : i64, tpu.core_type = #tpu.core_type<tc>, window_params = [{transform_indices = @transform_0, window_bounds = array<i64: 31>}, {transform_indices = @transform_1, window_bounds = array<i64: 13, 8, 128>}, {transform_indices = @transform_2, window_bounds = array<i64: 7, 8, 128>}, {transform_indices = @transform_3, window_bounds = array<i64: 4, 8, 128>}]} {
    %c0 = arith.constant 0 : index
    %0 = memref.load %arg1[%c0] : memref<31xf32, #tpu.memory_space<smem>>
    %c1 = arith.constant 1 : index
    %1 = memref.load %arg1[%c1] : memref<31xf32, #tpu.memory_space<smem>>
    %c2 = arith.constant 2 : index
    %2 = memref.load %arg1[%c2] : memref<31xf32, #tpu.memory_space<smem>>
    %c3 = arith.constant 3 : index
    %3 = memref.load %arg1[%c3] : memref<31xf32, #tpu.memory_space<smem>>
    %c4 = arith.constant 4 : index
    %4 = memref.load %arg1[%c4] : memref<31xf32, #tpu.memory_space<smem>>
    %c5 = arith.constant 5 : index
    %5 = memref.load %arg1[%c5] : memref<31xf32, #tpu.memory_space<smem>>
    %c6 = arith.constant 6 : index
    %6 = memref.load %arg1[%c6] : memref<31xf32, #tpu.memory_space<smem>>
    %c7 = arith.constant 7 : index
    %7 = memref.load %arg1[%c7] : memref<31xf32, #tpu.memory_space<smem>>
    %c8 = arith.constant 8 : index
    %8 = memref.load %arg1[%c8] : memref<31xf32, #tpu.memory_space<smem>>
    %c9 = arith.constant 9 : index
    %9 = memref.load %arg1[%c9] : memref<31xf32, #tpu.memory_space<smem>>
    %c10 = arith.constant 10 : index
    %10 = memref.load %arg1[%c10] : memref<31xf32, #tpu.memory_space<smem>>
    %c11 = arith.constant 11 : index
    %11 = memref.load %arg1[%c11] : memref<31xf32, #tpu.memory_space<smem>>
    %c12 = arith.constant 12 : index
    %12 = memref.load %arg1[%c12] : memref<31xf32, #tpu.memory_space<smem>>
    %c13 = arith.constant 13 : index
    %13 = memref.load %arg1[%c13] : memref<31xf32, #tpu.memory_space<smem>>
    %c14 = arith.constant 14 : index
    %14 = memref.load %arg1[%c14] : memref<31xf32, #tpu.memory_space<smem>>
    %c15 = arith.constant 15 : index
    %15 = memref.load %arg1[%c15] : memref<31xf32, #tpu.memory_space<smem>>
    %c16 = arith.constant 16 : index
    %16 = memref.load %arg1[%c16] : memref<31xf32, #tpu.memory_space<smem>>
    %c17 = arith.constant 17 : index
    %17 = memref.load %arg1[%c17] : memref<31xf32, #tpu.memory_space<smem>>
    %c18 = arith.constant 18 : index
    %18 = memref.load %arg1[%c18] : memref<31xf32, #tpu.memory_space<smem>>
    %c19 = arith.constant 19 : index
    %19 = memref.load %arg1[%c19] : memref<31xf32, #tpu.memory_space<smem>>
    %c20 = arith.constant 20 : index
    %20 = memref.load %arg1[%c20] : memref<31xf32, #tpu.memory_space<smem>>
    %c21 = arith.constant 21 : index
    %21 = memref.load %arg1[%c21] : memref<31xf32, #tpu.memory_space<smem>>
    %c22 = arith.constant 22 : index
    %22 = memref.load %arg1[%c22] : memref<31xf32, #tpu.memory_space<smem>>
    %c23 = arith.constant 23 : index
    %23 = memref.load %arg1[%c23] : memref<31xf32, #tpu.memory_space<smem>>
    %c24 = arith.constant 24 : index
    %24 = memref.load %arg1[%c24] : memref<31xf32, #tpu.memory_space<smem>>
    %c25 = arith.constant 25 : index
    %25 = memref.load %arg1[%c25] : memref<31xf32, #tpu.memory_space<smem>>
    %c26 = arith.constant 26 : index
    %26 = memref.load %arg1[%c26] : memref<31xf32, #tpu.memory_space<smem>>
    %c27 = arith.constant 27 : index
    %27 = memref.load %arg1[%c27] : memref<31xf32, #tpu.memory_space<smem>>
    %c28 = arith.constant 28 : index
    %28 = memref.load %arg1[%c28] : memref<31xf32, #tpu.memory_space<smem>>
    %c29 = arith.constant 29 : index
    %29 = memref.load %arg1[%c29] : memref<31xf32, #tpu.memory_space<smem>>
    %c30 = arith.constant 30 : index
    %30 = memref.load %arg1[%c30] : memref<31xf32, #tpu.memory_space<smem>>
    %c0_0 = arith.constant 0 : index
    %c0_1 = arith.constant 0 : index
    %c0_2 = arith.constant 0 : index
    %31 = vector.load %arg2[%c0_0, %c0_1, %c0_2] : memref<13x8x128xf32, #tpu.memory_space<vmem>>, vector<1x8x128xf32>
    %32 = vector.shape_cast %31 : vector<1x8x128xf32> to vector<8x128xf32>
    %c1_3 = arith.constant 1 : index
    %c0_4 = arith.constant 0 : index
    %c0_5 = arith.constant 0 : index
    %33 = vector.load %arg2[%c1_3, %c0_4, %c0_5] : memref<13x8x128xf32, #tpu.memory_space<vmem>>, vector<1x8x128xf32>
    %34 = vector.shape_cast %33 : vector<1x8x128xf32> to vector<8x128xf32>
    %c2_6 = arith.constant 2 : index
    %c0_7 = arith.constant 0 : index
    %c0_8 = arith.constant 0 : index
    %35 = vector.load %arg2[%c2_6, %c0_7, %c0_8] : memref<13x8x128xf32, #tpu.memory_space<vmem>>, vector<1x8x128xf32>
    %36 = vector.shape_cast %35 : vector<1x8x128xf32> to vector<8x128xf32>
    %c3_9 = arith.constant 3 : index
    %c0_10 = arith.constant 0 : index
    %c0_11 = arith.constant 0 : index
    %37 = vector.load %arg2[%c3_9, %c0_10, %c0_11] : memref<13x8x128xf32, #tpu.memory_space<vmem>>, vector<1x8x128xf32>
    %38 = vector.shape_cast %37 : vector<1x8x128xf32> to vector<8x128xf32>
    %c4_12 = arith.constant 4 : index
    %c0_13 = arith.constant 0 : index
    %c0_14 = arith.constant 0 : index
    %39 = vector.load %arg2[%c4_12, %c0_13, %c0_14] : memref<13x8x128xf32, #tpu.memory_space<vmem>>, vector<1x8x128xf32>
    %40 = vector.shape_cast %39 : vector<1x8x128xf32> to vector<8x128xf32>
    %c5_15 = arith.constant 5 : index
    %c0_16 = arith.constant 0 : index
    %c0_17 = arith.constant 0 : index
    %41 = vector.load %arg2[%c5_15, %c0_16, %c0_17] : memref<13x8x128xf32, #tpu.memory_space<vmem>>, vector<1x8x128xf32>
    %42 = vector.shape_cast %41 : vector<1x8x128xf32> to vector<8x128xf32>
    %c6_18 = arith.constant 6 : index
    %c0_19 = arith.constant 0 : index
    %c0_20 = arith.constant 0 : index
    %43 = vector.load %arg2[%c6_18, %c0_19, %c0_20] : memref<13x8x128xf32, #tpu.memory_space<vmem>>, vector<1x8x128xf32>
    %44 = vector.shape_cast %43 : vector<1x8x128xf32> to vector<8x128xf32>
    %c7_21 = arith.constant 7 : index
    %c0_22 = arith.constant 0 : index
    %c0_23 = arith.constant 0 : index
    %45 = vector.load %arg2[%c7_21, %c0_22, %c0_23] : memref<13x8x128xf32, #tpu.memory_space<vmem>>, vector<1x8x128xf32>
    %46 = vector.shape_cast %45 : vector<1x8x128xf32> to vector<8x128xf32>
    %c8_24 = arith.constant 8 : index
    %c0_25 = arith.constant 0 : index
    %c0_26 = arith.constant 0 : index
    %47 = vector.load %arg2[%c8_24, %c0_25, %c0_26] : memref<13x8x128xf32, #tpu.memory_space<vmem>>, vector<1x8x128xf32>
    %48 = vector.shape_cast %47 : vector<1x8x128xf32> to vector<8x128xf32>
    %c9_27 = arith.constant 9 : index
    %c0_28 = arith.constant 0 : index
    %c0_29 = arith.constant 0 : index
    %49 = vector.load %arg2[%c9_27, %c0_28, %c0_29] : memref<13x8x128xf32, #tpu.memory_space<vmem>>, vector<1x8x128xf32>
    %50 = vector.shape_cast %49 : vector<1x8x128xf32> to vector<8x128xf32>
    %c10_30 = arith.constant 10 : index
    %c0_31 = arith.constant 0 : index
    %c0_32 = arith.constant 0 : index
    %51 = vector.load %arg2[%c10_30, %c0_31, %c0_32] : memref<13x8x128xf32, #tpu.memory_space<vmem>>, vector<1x8x128xf32>
    %52 = vector.shape_cast %51 : vector<1x8x128xf32> to vector<8x128xf32>
    %c11_33 = arith.constant 11 : index
    %c0_34 = arith.constant 0 : index
    %c0_35 = arith.constant 0 : index
    %53 = vector.load %arg2[%c11_33, %c0_34, %c0_35] : memref<13x8x128xf32, #tpu.memory_space<vmem>>, vector<1x8x128xf32>
    %54 = vector.shape_cast %53 : vector<1x8x128xf32> to vector<8x128xf32>
    %c12_36 = arith.constant 12 : index
    %c0_37 = arith.constant 0 : index
    %c0_38 = arith.constant 0 : index
    %55 = vector.load %arg2[%c12_36, %c0_37, %c0_38] : memref<13x8x128xf32, #tpu.memory_space<vmem>>, vector<1x8x128xf32>
    %56 = vector.shape_cast %55 : vector<1x8x128xf32> to vector<8x128xf32>
    %c0_39 = arith.constant 0 : index
    %c0_40 = arith.constant 0 : index
    %c0_41 = arith.constant 0 : index
    %57 = vector.load %arg3[%c0_39, %c0_40, %c0_41] : memref<7x8x128xf32, #tpu.memory_space<vmem>>, vector<1x8x128xf32>
    %58 = vector.shape_cast %57 : vector<1x8x128xf32> to vector<8x128xf32>
    %c1_42 = arith.constant 1 : index
    %c0_43 = arith.constant 0 : index
    %c0_44 = arith.constant 0 : index
    %59 = vector.load %arg3[%c1_42, %c0_43, %c0_44] : memref<7x8x128xf32, #tpu.memory_space<vmem>>, vector<1x8x128xf32>
    %60 = vector.shape_cast %59 : vector<1x8x128xf32> to vector<8x128xf32>
    %c2_45 = arith.constant 2 : index
    %c0_46 = arith.constant 0 : index
    %c0_47 = arith.constant 0 : index
    %61 = vector.load %arg3[%c2_45, %c0_46, %c0_47] : memref<7x8x128xf32, #tpu.memory_space<vmem>>, vector<1x8x128xf32>
    %62 = vector.shape_cast %61 : vector<1x8x128xf32> to vector<8x128xf32>
    %c3_48 = arith.constant 3 : index
    %c0_49 = arith.constant 0 : index
    %c0_50 = arith.constant 0 : index
    %63 = vector.load %arg3[%c3_48, %c0_49, %c0_50] : memref<7x8x128xf32, #tpu.memory_space<vmem>>, vector<1x8x128xf32>
    %64 = vector.shape_cast %63 : vector<1x8x128xf32> to vector<8x128xf32>
    %c4_51 = arith.constant 4 : index
    %c0_52 = arith.constant 0 : index
    %c0_53 = arith.constant 0 : index
    %65 = vector.load %arg3[%c4_51, %c0_52, %c0_53] : memref<7x8x128xf32, #tpu.memory_space<vmem>>, vector<1x8x128xf32>
    %66 = vector.shape_cast %65 : vector<1x8x128xf32> to vector<8x128xf32>
    %c5_54 = arith.constant 5 : index
    %c0_55 = arith.constant 0 : index
    %c0_56 = arith.constant 0 : index
    %67 = vector.load %arg3[%c5_54, %c0_55, %c0_56] : memref<7x8x128xf32, #tpu.memory_space<vmem>>, vector<1x8x128xf32>
    %68 = vector.shape_cast %67 : vector<1x8x128xf32> to vector<8x128xf32>
    %c6_57 = arith.constant 6 : index
    %c0_58 = arith.constant 0 : index
    %c0_59 = arith.constant 0 : index
    %69 = vector.load %arg3[%c6_57, %c0_58, %c0_59] : memref<7x8x128xf32, #tpu.memory_space<vmem>>, vector<1x8x128xf32>
    %70 = vector.shape_cast %69 : vector<1x8x128xf32> to vector<8x128xf32>
    %71 = arith.subf %58, %32 : vector<8x128xf32>
    %72 = vector.broadcast %0 : f32 to vector<8x128xf32>
    %73 = arith.mulf %71, %72 : vector<8x128xf32>
    %74 = arith.subf %64, %46 : vector<8x128xf32>
    %75 = vector.broadcast %3 : f32 to vector<8x128xf32>
    %76 = arith.mulf %74, %75 : vector<8x128xf32>
    %77 = arith.addf %73, %76 : vector<8x128xf32>
    %78 = vector.broadcast %6 : f32 to vector<8x128xf32>
    %79 = arith.addf %77, %78 : vector<8x128xf32>
    %80 = arith.subf %60, %34 : vector<8x128xf32>
    %81 = vector.broadcast %1 : f32 to vector<8x128xf32>
    %82 = arith.mulf %80, %81 : vector<8x128xf32>
    %83 = arith.subf %66, %48 : vector<8x128xf32>
    %84 = vector.broadcast %4 : f32 to vector<8x128xf32>
    %85 = arith.mulf %83, %84 : vector<8x128xf32>
    %86 = arith.addf %82, %85 : vector<8x128xf32>
    %87 = vector.broadcast %7 : f32 to vector<8x128xf32>
    %88 = arith.addf %86, %87 : vector<8x128xf32>
    %89 = arith.subf %62, %36 : vector<8x128xf32>
    %90 = vector.broadcast %2 : f32 to vector<8x128xf32>
    %91 = arith.mulf %89, %90 : vector<8x128xf32>
    %92 = arith.subf %68, %50 : vector<8x128xf32>
    %93 = vector.broadcast %5 : f32 to vector<8x128xf32>
    %94 = arith.mulf %92, %93 : vector<8x128xf32>
    %95 = arith.addf %91, %94 : vector<8x128xf32>
    %96 = vector.broadcast %8 : f32 to vector<8x128xf32>
    %97 = arith.addf %95, %96 : vector<8x128xf32>
    %98 = arith.mulf %42, %42 : vector<8x128xf32>
    %99 = arith.mulf %44, %44 : vector<8x128xf32>
    %100 = arith.addf %98, %99 : vector<8x128xf32>
    %cst = arith.constant 2.000000e+00 : f32
    %101 = vector.broadcast %cst : f32 to vector<8x128xf32>
    %102 = arith.mulf %101, %100 : vector<8x128xf32>
    %cst_60 = arith.constant 1.000000e+00 : f32
    %103 = vector.broadcast %cst_60 : f32 to vector<8x128xf32>
    %104 = arith.subf %103, %102 : vector<8x128xf32>
    %105 = arith.mulf %40, %42 : vector<8x128xf32>
    %106 = arith.mulf %38, %44 : vector<8x128xf32>
    %107 = arith.subf %105, %106 : vector<8x128xf32>
    %cst_61 = arith.constant 2.000000e+00 : f32
    %108 = vector.broadcast %cst_61 : f32 to vector<8x128xf32>
    %109 = arith.mulf %108, %107 : vector<8x128xf32>
    %110 = arith.mulf %40, %44 : vector<8x128xf32>
    %111 = arith.mulf %38, %42 : vector<8x128xf32>
    %112 = arith.addf %110, %111 : vector<8x128xf32>
    %cst_62 = arith.constant 2.000000e+00 : f32
    %113 = vector.broadcast %cst_62 : f32 to vector<8x128xf32>
    %114 = arith.mulf %113, %112 : vector<8x128xf32>
    %115 = arith.mulf %40, %42 : vector<8x128xf32>
    %116 = arith.mulf %38, %44 : vector<8x128xf32>
    %117 = arith.addf %115, %116 : vector<8x128xf32>
    %cst_63 = arith.constant 2.000000e+00 : f32
    %118 = vector.broadcast %cst_63 : f32 to vector<8x128xf32>
    %119 = arith.mulf %118, %117 : vector<8x128xf32>
    %120 = arith.mulf %40, %40 : vector<8x128xf32>
    %121 = arith.mulf %44, %44 : vector<8x128xf32>
    %122 = arith.addf %120, %121 : vector<8x128xf32>
    %cst_64 = arith.constant 2.000000e+00 : f32
    %123 = vector.broadcast %cst_64 : f32 to vector<8x128xf32>
    %124 = arith.mulf %123, %122 : vector<8x128xf32>
    %cst_65 = arith.constant 1.000000e+00 : f32
    %125 = vector.broadcast %cst_65 : f32 to vector<8x128xf32>
    %126 = arith.subf %125, %124 : vector<8x128xf32>
    %127 = arith.mulf %42, %44 : vector<8x128xf32>
    %128 = arith.mulf %38, %40 : vector<8x128xf32>
    %129 = arith.subf %127, %128 : vector<8x128xf32>
    %cst_66 = arith.constant 2.000000e+00 : f32
    %130 = vector.broadcast %cst_66 : f32 to vector<8x128xf32>
    %131 = arith.mulf %130, %129 : vector<8x128xf32>
    %132 = arith.mulf %40, %44 : vector<8x128xf32>
    %133 = arith.mulf %38, %42 : vector<8x128xf32>
    %134 = arith.subf %132, %133 : vector<8x128xf32>
    %cst_67 = arith.constant 2.000000e+00 : f32
    %135 = vector.broadcast %cst_67 : f32 to vector<8x128xf32>
    %136 = arith.mulf %135, %134 : vector<8x128xf32>
    %137 = arith.mulf %42, %44 : vector<8x128xf32>
    %138 = arith.mulf %38, %40 : vector<8x128xf32>
    %139 = arith.addf %137, %138 : vector<8x128xf32>
    %cst_68 = arith.constant 2.000000e+00 : f32
    %140 = vector.broadcast %cst_68 : f32 to vector<8x128xf32>
    %141 = arith.mulf %140, %139 : vector<8x128xf32>
    %142 = arith.mulf %40, %40 : vector<8x128xf32>
    %143 = arith.mulf %42, %42 : vector<8x128xf32>
    %144 = arith.addf %142, %143 : vector<8x128xf32>
    %cst_69 = arith.constant 2.000000e+00 : f32
    %145 = vector.broadcast %cst_69 : f32 to vector<8x128xf32>
    %146 = arith.mulf %145, %144 : vector<8x128xf32>
    %cst_70 = arith.constant 1.000000e+00 : f32
    %147 = vector.broadcast %cst_70 : f32 to vector<8x128xf32>
    %148 = arith.subf %147, %146 : vector<8x128xf32>
    %149 = math.cos %70 : vector<8x128xf32>
    %150 = math.sin %70 : vector<8x128xf32>
    %151 = arith.mulf %79, %79 : vector<8x128xf32>
    %152 = arith.mulf %88, %88 : vector<8x128xf32>
    %153 = arith.addf %151, %152 : vector<8x128xf32>
    %154 = arith.mulf %97, %97 : vector<8x128xf32>
    %155 = arith.addf %153, %154 : vector<8x128xf32>
    %156 = math.rsqrt %155 : vector<8x128xf32>
    %157 = arith.mulf %79, %156 : vector<8x128xf32>
    %158 = arith.mulf %88, %156 : vector<8x128xf32>
    %159 = arith.mulf %97, %156 : vector<8x128xf32>
    %cst_71 = arith.constant 0.000000e+00 : f32
    %160 = vector.broadcast %cst_71 : f32 to vector<8x128xf32>
    %161 = arith.subf %160, %159 : vector<8x128xf32>
    %162 = arith.mulf %161, %150 : vector<8x128xf32>
    %163 = arith.mulf %159, %149 : vector<8x128xf32>
    %164 = arith.mulf %157, %150 : vector<8x128xf32>
    %165 = arith.mulf %158, %149 : vector<8x128xf32>
    %166 = arith.subf %164, %165 : vector<8x128xf32>
    %167 = arith.mulf %162, %162 : vector<8x128xf32>
    %168 = arith.mulf %163, %163 : vector<8x128xf32>
    %169 = arith.addf %167, %168 : vector<8x128xf32>
    %170 = arith.mulf %166, %166 : vector<8x128xf32>
    %171 = arith.addf %169, %170 : vector<8x128xf32>
    %cst_72 = arith.constant 1.000000e-24 : f32
    %172 = vector.broadcast %cst_72 : f32 to vector<8x128xf32>
    %173 = arith.maximumf %171, %172 : vector<8x128xf32>
    %174 = math.rsqrt %173 : vector<8x128xf32>
    %175 = arith.mulf %162, %174 : vector<8x128xf32>
    %176 = arith.mulf %163, %174 : vector<8x128xf32>
    %177 = arith.mulf %166, %174 : vector<8x128xf32>
    %178 = arith.mulf %157, %109 : vector<8x128xf32>
    %179 = arith.mulf %158, %126 : vector<8x128xf32>
    %180 = arith.addf %178, %179 : vector<8x128xf32>
    %181 = arith.mulf %159, %141 : vector<8x128xf32>
    %182 = arith.addf %180, %181 : vector<8x128xf32>
    %183 = arith.mulf %175, %114 : vector<8x128xf32>
    %184 = arith.mulf %176, %131 : vector<8x128xf32>
    %185 = arith.addf %183, %184 : vector<8x128xf32>
    %186 = arith.mulf %177, %148 : vector<8x128xf32>
    %187 = arith.addf %185, %186 : vector<8x128xf32>
    %188 = arith.mulf %149, %114 : vector<8x128xf32>
    %189 = arith.mulf %150, %131 : vector<8x128xf32>
    %190 = arith.addf %188, %189 : vector<8x128xf32>
    %191 = arith.mulf %157, %104 : vector<8x128xf32>
    %192 = arith.mulf %158, %119 : vector<8x128xf32>
    %193 = arith.addf %191, %192 : vector<8x128xf32>
    %194 = arith.mulf %159, %136 : vector<8x128xf32>
    %195 = arith.addf %193, %194 : vector<8x128xf32>
    %196 = arith.mulf %175, %104 : vector<8x128xf32>
    %197 = arith.mulf %176, %119 : vector<8x128xf32>
    %198 = arith.addf %196, %197 : vector<8x128xf32>
    %199 = arith.mulf %177, %136 : vector<8x128xf32>
    %200 = arith.addf %198, %199 : vector<8x128xf32>
    %201 = arith.mulf %149, %109 : vector<8x128xf32>
    %202 = arith.mulf %150, %126 : vector<8x128xf32>
    %203 = arith.addf %201, %202 : vector<8x128xf32>
    %204 = arith.subf %182, %187 : vector<8x128xf32>
    %cst_73 = arith.constant 5.000000e-01 : f32
    %205 = vector.broadcast %cst_73 : f32 to vector<8x128xf32>
    %206 = arith.mulf %205, %204 : vector<8x128xf32>
    %207 = arith.subf %190, %195 : vector<8x128xf32>
    %cst_74 = arith.constant 5.000000e-01 : f32
    %208 = vector.broadcast %cst_74 : f32 to vector<8x128xf32>
    %209 = arith.mulf %208, %207 : vector<8x128xf32>
    %210 = arith.subf %200, %203 : vector<8x128xf32>
    %cst_75 = arith.constant 5.000000e-01 : f32
    %211 = vector.broadcast %cst_75 : f32 to vector<8x128xf32>
    %212 = arith.mulf %211, %210 : vector<8x128xf32>
    %cst_76 = arith.constant 0.000000e+00 : f32
    %213 = vector.broadcast %cst_76 : f32 to vector<8x128xf32>
    %214 = arith.subf %213, %206 : vector<8x128xf32>
    %215 = vector.broadcast %9 : f32 to vector<8x128xf32>
    %216 = arith.mulf %214, %215 : vector<8x128xf32>
    %217 = vector.broadcast %12 : f32 to vector<8x128xf32>
    %218 = arith.mulf %52, %217 : vector<8x128xf32>
    %219 = arith.subf %216, %218 : vector<8x128xf32>
    %cst_77 = arith.constant 0.000000e+00 : f32
    %220 = vector.broadcast %cst_77 : f32 to vector<8x128xf32>
    %221 = arith.subf %220, %209 : vector<8x128xf32>
    %222 = vector.broadcast %10 : f32 to vector<8x128xf32>
    %223 = arith.mulf %221, %222 : vector<8x128xf32>
    %224 = vector.broadcast %13 : f32 to vector<8x128xf32>
    %225 = arith.mulf %54, %224 : vector<8x128xf32>
    %226 = arith.subf %223, %225 : vector<8x128xf32>
    %cst_78 = arith.constant 0.000000e+00 : f32
    %227 = vector.broadcast %cst_78 : f32 to vector<8x128xf32>
    %228 = arith.subf %227, %212 : vector<8x128xf32>
    %229 = vector.broadcast %11 : f32 to vector<8x128xf32>
    %230 = arith.mulf %228, %229 : vector<8x128xf32>
    %231 = vector.broadcast %14 : f32 to vector<8x128xf32>
    %232 = arith.mulf %56, %231 : vector<8x128xf32>
    %233 = arith.subf %230, %232 : vector<8x128xf32>
    %234 = arith.mulf %79, %114 : vector<8x128xf32>
    %235 = arith.mulf %88, %131 : vector<8x128xf32>
    %236 = arith.addf %234, %235 : vector<8x128xf32>
    %237 = arith.mulf %97, %148 : vector<8x128xf32>
    %238 = arith.addf %236, %237 : vector<8x128xf32>
    %239 = vector.broadcast %15 : f32 to vector<8x128xf32>
    %240 = arith.mulf %239, %219 : vector<8x128xf32>
    %241 = vector.broadcast %16 : f32 to vector<8x128xf32>
    %242 = arith.mulf %241, %226 : vector<8x128xf32>
    %243 = arith.addf %240, %242 : vector<8x128xf32>
    %244 = vector.broadcast %17 : f32 to vector<8x128xf32>
    %245 = arith.mulf %244, %233 : vector<8x128xf32>
    %246 = arith.addf %243, %245 : vector<8x128xf32>
    %247 = vector.broadcast %18 : f32 to vector<8x128xf32>
    %248 = arith.mulf %247, %238 : vector<8x128xf32>
    %249 = arith.addf %246, %248 : vector<8x128xf32>
    %cst_79 = arith.constant 1.000000e+00 : f32
    %250 = vector.broadcast %cst_79 : f32 to vector<8x128xf32>
    %251 = arith.subf %249, %250 : vector<8x128xf32>
    %c0_80 = arith.constant 0 : index
    %c0_81 = arith.constant 0 : index
    %c0_82 = arith.constant 0 : index
    %252 = vector.load %arg4[%c0_80, %c0_81, %c0_82] : memref<4x8x128xf32, #tpu.memory_space<vmem>>, vector<1x8x128xf32>
    %253 = vector.shape_cast %252 : vector<1x8x128xf32> to vector<8x128xf32>
    %254 = vector.shape_cast %251 : vector<8x128xf32> to vector<1x8x128xf32>
    tpu.vector_store %arg4[%c0_80, %c0_81, %c0_82], %254 {strides = array<i32>} : memref<4x8x128xf32, #tpu.memory_space<vmem>>, vector<1x8x128xf32>,
    %255 = vector.broadcast %19 : f32 to vector<8x128xf32>
    %256 = arith.mulf %255, %219 : vector<8x128xf32>
    %257 = vector.broadcast %20 : f32 to vector<8x128xf32>
    %258 = arith.mulf %257, %226 : vector<8x128xf32>
    %259 = arith.addf %256, %258 : vector<8x128xf32>
    %260 = vector.broadcast %21 : f32 to vector<8x128xf32>
    %261 = arith.mulf %260, %233 : vector<8x128xf32>
    %262 = arith.addf %259, %261 : vector<8x128xf32>
    %263 = vector.broadcast %22 : f32 to vector<8x128xf32>
    %264 = arith.mulf %263, %238 : vector<8x128xf32>
    %265 = arith.addf %262, %264 : vector<8x128xf32>
    %cst_83 = arith.constant 1.000000e+00 : f32
    %266 = vector.broadcast %cst_83 : f32 to vector<8x128xf32>
    %267 = arith.subf %265, %266 : vector<8x128xf32>
    %c1_84 = arith.constant 1 : index
    %c0_85 = arith.constant 0 : index
    %c0_86 = arith.constant 0 : index
    %268 = vector.load %arg4[%c1_84, %c0_85, %c0_86] : memref<4x8x128xf32, #tpu.memory_space<vmem>>, vector<1x8x128xf32>
    %269 = vector.shape_cast %268 : vector<1x8x128xf32> to vector<8x128xf32>
    %270 = vector.shape_cast %267 : vector<8x128xf32> to vector<1x8x128xf32>
    tpu.vector_store %arg4[%c1_84, %c0_85, %c0_86], %270 {strides = array<i32>} : memref<4x8x128xf32, #tpu.memory_space<vmem>>, vector<1x8x128xf32>,
    %271 = vector.broadcast %23 : f32 to vector<8x128xf32>
    %272 = arith.mulf %271, %219 : vector<8x128xf32>
    %273 = vector.broadcast %24 : f32 to vector<8x128xf32>
    %274 = arith.mulf %273, %226 : vector<8x128xf32>
    %275 = arith.addf %272, %274 : vector<8x128xf32>
    %276 = vector.broadcast %25 : f32 to vector<8x128xf32>
    %277 = arith.mulf %276, %233 : vector<8x128xf32>
    %278 = arith.addf %275, %277 : vector<8x128xf32>
    %279 = vector.broadcast %26 : f32 to vector<8x128xf32>
    %280 = arith.mulf %279, %238 : vector<8x128xf32>
    %281 = arith.addf %278, %280 : vector<8x128xf32>
    %cst_87 = arith.constant 1.000000e+00 : f32
    %282 = vector.broadcast %cst_87 : f32 to vector<8x128xf32>
    %283 = arith.subf %281, %282 : vector<8x128xf32>
    %c2_88 = arith.constant 2 : index
    %c0_89 = arith.constant 0 : index
    %c0_90 = arith.constant 0 : index
    %284 = vector.load %arg4[%c2_88, %c0_89, %c0_90] : memref<4x8x128xf32, #tpu.memory_space<vmem>>, vector<1x8x128xf32>
    %285 = vector.shape_cast %284 : vector<1x8x128xf32> to vector<8x128xf32>
    %286 = vector.shape_cast %283 : vector<8x128xf32> to vector<1x8x128xf32>
    tpu.vector_store %arg4[%c2_88, %c0_89, %c0_90], %286 {strides = array<i32>} : memref<4x8x128xf32, #tpu.memory_space<vmem>>, vector<1x8x128xf32>,
    %287 = vector.broadcast %27 : f32 to vector<8x128xf32>
    %288 = arith.mulf %287, %219 : vector<8x128xf32>
    %289 = vector.broadcast %28 : f32 to vector<8x128xf32>
    %290 = arith.mulf %289, %226 : vector<8x128xf32>
    %291 = arith.addf %288, %290 : vector<8x128xf32>
    %292 = vector.broadcast %29 : f32 to vector<8x128xf32>
    %293 = arith.mulf %292, %233 : vector<8x128xf32>
    %294 = arith.addf %291, %293 : vector<8x128xf32>
    %295 = vector.broadcast %30 : f32 to vector<8x128xf32>
    %296 = arith.mulf %295, %238 : vector<8x128xf32>
    %297 = arith.addf %294, %296 : vector<8x128xf32>
    %cst_91 = arith.constant 1.000000e+00 : f32
    %298 = vector.broadcast %cst_91 : f32 to vector<8x128xf32>
    %299 = arith.subf %297, %298 : vector<8x128xf32>
    %c3_92 = arith.constant 3 : index
    %c0_93 = arith.constant 0 : index
    %c0_94 = arith.constant 0 : index
    %300 = vector.load %arg4[%c3_92, %c0_93, %c0_94] : memref<4x8x128xf32, #tpu.memory_space<vmem>>, vector<1x8x128xf32>
    %301 = vector.shape_cast %300 : vector<1x8x128xf32> to vector<8x128xf32>
    %302 = vector.shape_cast %299 : vector<8x128xf32> to vector<1x8x128xf32>
    tpu.vector_store %arg4[%c3_92, %c0_93, %c0_94], %302 {strides = array<i32>} : memref<4x8x128xf32, #tpu.memory_space<vmem>>, vector<1x8x128xf32>,
    return
  }
  func.func @transform_0(%arg0: i32) -> i32 {
    %c0_i32 = arith.constant 0 : i32
    %c0_i32_0 = arith.constant 0 : i32
    return %c0_i32 : i32
  }
  func.func @transform_1(%arg0: i32) -> (i32, i32, i32) {
    %c0_i32 = arith.constant 0 : i32
    %c0_i32_0 = arith.constant 0 : i32
    %c0_i32_1 = arith.constant 0 : i32
    return %c0_i32, %arg0, %c0_i32_0 : i32, i32, i32
  }
  func.func @transform_2(%arg0: i32) -> (i32, i32, i32) {
    %c0_i32 = arith.constant 0 : i32
    %c0_i32_0 = arith.constant 0 : i32
    %c0_i32_1 = arith.constant 0 : i32
    return %c0_i32, %arg0, %c0_i32_0 : i32, i32, i32
  }
  func.func @transform_3(%arg0: i32) -> (i32, i32, i32) {
    %c0_i32 = arith.constant 0 : i32
    %c0_i32_0 = arith.constant 0 : i32
    %c0_i32_1 = arith.constant 0 : i32
    return %c0_i32, %arg0, %c0_i32_0 : i32, i32, i32
  }
}

</mosaic_0001>

<bundles_post_ra>
// kernel: tpu_custom_call.1
= control target key start
LH: loop header
LB: loop body
LE: loop exit
PB: predicated region body
PF: predicated region fallthrough
CT: control target
= control target key end

     0   :  { %8 = vsyncpa [#allocation5], 0  ;;  %s1147_s0 = inlined_call_operand.hbm [shape: f32[31], index: 0, kind: input, shape index: {}]   ;;  %s1148_s1 = inlined_call_operand.hbm [shape: f32[13,8,128], index: 1, kind: input, shape index: {}]   ;;  %s1149_s2 = inlined_call_operand.hbm [shape: f32[7,8,128], index: 2, kind: input, shape index: {}]   ;;  %s1150_s3 = inlined_call_operand.hbm [shape: f32[4,8,128], index: 3, kind: output, shape index: {}]  }
   0x1   :  { %9 = vsyncpa [#allocation3], 0 }
   0x2   :  { %10 = vsyncpa [#allocation8], 0 }
   0x3   :  { %11 = vsyncpa [#allocation4], 0  ;;  %s17_s14 = sshll.u32 %s1147_s0, 4  ;;  %s25_s17 = sshll.u32 %s1148_s1, 4  ;;  %s18_s14 = int_to_ptr.hbm [resolvable:$true] %s17_s14  ;;  %s26_s17 = int_to_ptr.hbm [resolvable:$true] %s25_s17 }
   0x4   :  { %s818_s18 = smov [#allocation2]   ;;  %s819_s19 = smov [#allocation6]  }
   0x5   :  { %20 = dma.hbm_to_smem %s18_s14, 16, %s818_s18, [#allocation5]  }
   0x6   :  { %s27_s20 = sshll.u32 %s819_s19, 4  ;;  %s820_s21 = smov 128   ;;  %s28_s20 = int_to_ptr.vmem [resolvable:$true] %s27_s20 }
   0x7   :  { %s821_s22 = smov 8   ;;  %s38_s0 = sshll.u32 %s1149_s2, 4  ;;  %s39_s0 = int_to_ptr.hbm [resolvable:$true] %s38_s0 }
   0x8   :  { %33 = dma.hbm_to_vmem [thread:$0]  %s26_s17, 1664, %s28_s20, [#allocation3], %s820_s21, %s820_s21, %s821_s22  }
   0x9   :  { %s822_s25 = smov [#allocation7]  }
   0xa   :  { %s40_s26 = sshll.u32 %s822_s25, 4  ;;  %s41_s26 = int_to_ptr.vmem [resolvable:$true] %s40_s26 }
   0xb   :  { %46 = dma.hbm_to_vmem [thread:$0]  %s39_s0, 896, %s41_s26, [#allocation8], %s820_s21, %s820_s21, %s821_s22  }
   0xc   :  { %810 = dma.done.wait [#allocation5], 16  }
   0xd   :  { %811 = vsyncadd [#allocation5], 4294967280 }
   0xe   :  { %812 = dma.done.wait [#allocation3], 1664  }
   0xf   :  { %813 = vsyncadd [#allocation3], 4294965632 }
  0x10   :  { %814 = dma.done.wait [#allocation8], 896  }
  0x11   :  { %815 = vsyncadd [#allocation8], 4294966400 }
  0x12   :  { %59 = sfence }
  0x13   :  { %v866_v0 = vld [vmem:[#allocation7 + $0x30] sm:$0xff]  ;;  %s872_s1 = sld [smem:[#allocation2]]  ;;  %v823_v12 = vmov 683565275   ;;  %v824_v14 = vmov 2475754826  }
  0x14   :  { %v189_v1 = vand.u32 2139095040, %v866_v0  ;;  %v186_v3 = vand.u32 2147483647, %v866_v0  ;;  %v825_v16 = vmov 2131351028   ;;  %s882_s2 = sld [smem:[#allocation2 + $0x1]] }
  0x15   :  { %v826_v18 = vmov 2102212464   ;;  %v827_v20 = vmov 920167782   ;;  %v828_v26 = vmov 1326507024  }
  0x16   :  { %v190_v2 = vshrl.u32 %v189_v1, 23  ;;  %v193_v6 = vand.u32 8388607, %v186_v3  ;;  %v91_v29 = vld [vmem:[#allocation6] sm:$0xff]  ;;  %v116_v30 = vld [vmem:[#allocation7] sm:$0xff]  ;;  %v894_v35 = vld [vmem:[#allocation6 + $0x38] sm:$0xff] }
  0x17   :  { %v892_v34 = vld [vmem:[#allocation6 + $0x8] sm:$0xff]  ;;  %v897_v38 = vld [vmem:[#allocation6 + $0x10] sm:$0xff]  ;;  %v899_v39 = vld [vmem:[#allocation6 + $0x40] sm:$0xff]  ;;  %s912_s27 = sld [smem:[#allocation2 + $0x3]]  ;;  %v129_v44 = vsub.f32 %v116_v30, %v91_v29  ;;  %vm188_vm12 = vcmp.lt.s32.totalorder %v866_v0, 0 }
  0x18   :  { %v699_v4 = vadd.s32 4294967169, %v190_v2  ;;  %v194_v9 = vor.u32 8388608, %v193_v6  ;;  %v901_v40 = vld [vmem:[#allocation7 + $0x8] sm:$0xff]  ;;  %v903_v41 = vld [vmem:[#allocation7 + $0x18] sm:$0xff]  ;;  %s919_s28 = sld [smem:[#allocation2 + $0x4]]  ;;  %v921_v48 = vld [vmem:[#allocation7 + $0x10] sm:$0xff] }
  0x19   :  { %v130_v45 = vstv %s872_s1  ;;  %v923_v49 = vld [vmem:[#allocation7 + $0x20] sm:$0xff]  ;;  %v132_v54 = vsub.f32 %v903_v41, %v894_v35  ;;  %v138_v55 = vsub.f32 %v901_v40, %v892_v34  ;;  %v941_v59 = vld [vmem:[#allocation7 + $0x28] sm:$0xff]  ;;  %s952_s29 = sld [smem:[#allocation2 + $0x2]]  ;;  %vm187_vm13 = vcmp.le.f32.partialorder %v186_v3, 0.7853982 }
  0x1a   :  { %v196_v5 = vadd.s32 1, %v699_v4  ;;  %v887_v28 = vshll.u32 %v194_v9, 8  ;;  %v939_v58 = vld [vmem:[#allocation6 + $0x48] sm:$0xff]  ;;  %v131_v1 = vmul.f32 %v130_v45, %v129_v44  ;;  %v139_v2 = vstv %s882_s2  ;;  %s954_s30 = sld [smem:[#allocation2 + $0x5]] }
  0x1b   :  { %v141_v4 = vsub.f32 %v923_v49, %v899_v39  ;;  %s962_s4 = sld [smem:[#allocation2 + $0x6]] }
  0x1c   :  { %vm197_vm0 = vcmp.gt.s32.totalorder %v196_v5, 0  ;;  %v235_v52 = vand.u32 65535, %v887_v28  ;;  %v236_v53 = vshrl.u32 %v887_v28, 16  ;;  %s964_s5 = sld [smem:[#allocation2 + $0x7]] }
  0x1d   :  { %v198_v7 = vsel %vm197_vm0, %v196_v5, 0  ;;  %v147_v5 = vsub.f32 %v921_v48, %v897_v38  ;;  %s676_s6 = sld [smem:[#allocation2 + $0x8]] }
  0x1e   :  { %v200_v8 = vand.u32 31, %v198_v7  ;;  %v874_v10 = vshrl.u32 %v198_v7, 5  ;;  %s1054_s7 = sld [smem:[#allocation2 + $0x9]] }
  0x1f   :  { %s1057_s8 = sld [smem:[#allocation2 + $0xa]] }
  0x20   :  { %v876_v11 = vsub.s32 32, %v200_v8  ;;  %v203_v13 = vshll.u32 %v823_v12, %v200_v8  ;;  %v206_v15 = vshll.u32 %v824_v14, %v200_v8  ;;  %v209_v17 = vshll.u32 %v825_v16, %v200_v8  ;;  %s1059_s9 = sld [smem:[#allocation2 + $0xb]] }
  0x21   :  { %v212_v19 = vshll.u32 %v826_v18, %v200_v8  ;;  %v215_v21 = vshll.u32 %v827_v20, %v200_v8  ;;  %vm218_vm1 = vcmp.lt.s32.totalorder %v874_v10, 1  ;;  %vm221_vm2 = vcmp.lt.s32.totalorder %v874_v10, 4  ;;  %s1061_s10 = sld [smem:[#allocation2 + $0xc]] }
  0x22   :  { %v204_v22 = vshrl.u32 %v824_v14, %v876_v11  ;;  %v207_v23 = vshrl.u32 %v825_v16, %v876_v11  ;;  %v210_v24 = vshrl.u32 %v826_v18, %v876_v11  ;;  %v213_v25 = vshrl.u32 %v827_v20, %v876_v11  ;;  %s1064_s11 = sld [smem:[#allocation2 + $0xd]] }
  0x23   :  { %v216_v27 = vshrl.u32 %v828_v26, %v876_v11  ;;  %vm220_vm3 = vcmp.lt.s32.totalorder %v874_v10, 3  ;;  %vm219_vm4 = vcmp.lt.s32.totalorder %v874_v10, 2  ;;  %v202_v6 = vshrl.u32 %v823_v12, %v876_v11  ;;  %s1066_s12 = sld [smem:[#allocation2 + $0xe]] }
  0x24   :  { %v205_v31 = vor.u32 %v204_v22, %v203_v13  ;;  %v889_v32 = vor.u32 %v207_v23, %v206_v15  ;;  %v211_v33 = vor.u32 %v210_v24, %v209_v17  ;;  %v214_v36 = vor.u32 %v213_v25, %v212_v19  ;;  %s1068_s13 = sld [smem:[#allocation2 + $0xf]] }
  0x25   :  { %v217_v37 = vor.u32 %v216_v27, %v215_v21  ;;  %v150_v13 = vsub.f32 %v941_v59, %v939_v58  ;;  %v133_v20 = vstv %s912_s27  ;;  %v142_v22 = vstv %s919_s28  ;;  %s1070_s14 = sld [smem:[#allocation2 + $0x10]]  ;;  %s830_s28 = smov [#allocation9]  }
  0x26   :  { %v226_v42 = vsel %vm218_vm1, %v205_v31, %v889_v32  ;;  %v230_v43 = vsel %vm218_vm1, %v889_v32, %v211_v33  ;;  %v227_v46 = vsel %vm221_vm2, %v214_v36, 920167782  ;;  %v222_v23 = vsel %vm218_vm1, %v202_v6, %v205_v31  ;;  %s1072_s15 = sld [smem:[#allocation2 + $0x11]] }
  0x27   :  { %v231_v47 = vsel %vm221_vm2, %v217_v37, 1326507024  ;;  %v228_v50 = vsel %vm220_vm3, %v211_v33, %v227_v46  ;;  %v223_v25 = vsel %vm221_vm2, %v211_v33, 2102212464  ;;  %v829_v26 = vmov 0   ;;  %s1076_s16 = sld [smem:[#allocation2 + $0x12]] }
  0x28   :  { %v232_v51 = vsel %vm220_vm3, %v214_v36, %v231_v47  ;;  %v229_v56 = vsel %vm219_vm4, %v226_v42, %v228_v50  ;;  %v224_v33 = vsel %vm220_vm3, %v889_v32, %v223_v25  ;;  %v134_v41 = vmul.f32 %v133_v20, %v132_v54  ;;  %s1078_s17 = sld [smem:[#allocation2 + $0x13]] }
  0x29   :  { %v233_v57 = vsel %vm219_vm4, %v230_v43, %v232_v51  ;;  %v259_v62 = vand.u32 65535, %v229_v56  ;;  %v260_v63 = vshrl.u32 %v229_v56, 16  ;;  %v140_v42 = vmul.f32 %v139_v2, %v138_v55  ;;  %s1080_s18 = sld [smem:[#allocation2 + $0x14]] }
  0x2a   :  { %v237_v60 = vand.u32 65535, %v233_v57  ;;  %v238_v61 = vshrl.u32 %v233_v57, 16  ;;  %v143_v45 = vmul.f32 %v142_v22, %v141_v4  ;;  %v148_v46 = vstv %s952_s29  ;;  %s1082_s19 = sld [smem:[#allocation2 + $0x15]]  ;;  %s652_s29 = sshll.u32 %s830_s28, 4  ;;  %s653_s29 = int_to_ptr.vmem [resolvable:$true] %s652_s29 }
  0x2b   :  { %v261_v14 = vmul.u32 %v259_v62, %v235_v52  ;;  %v262_v15 = vmul.u32 %v260_v63, %v235_v52  ;;  %v263_v16 = vmul.u32 %v259_v62, %v236_v53  ;;  %v264_v21 = vmul.u32 %v260_v63, %v236_v53  ;;  %s1086_s20 = sld [smem:[#allocation2 + $0x16]] }
  0x2c   :  { %v239_v7 = vmul.u32 %v237_v60, %v235_v52  ;;  %v240_v8 = vmul.u32 %v238_v61, %v235_v52  ;;  %v241_v9 = vmul.u32 %v237_v60, %v236_v53  ;;  %v242_v17 = vmul.u32 %v238_v61, %v236_v53  ;;  %s1092_s23 = sld [smem:[#allocation2 + $0x17]] }
  0x2d   :  { %v265_v11 = vshll.u32 %v262_v15, 16  ;;  %v267_v12 = vshll.u32 %v263_v16, 16  ;;  %v266_v31 = vshrl.u32 %v262_v15, 16  ;;  %v268_v43 = vshrl.u32 %v263_v16, 16  ;;  %s1096_s24 = sld [smem:[#allocation2 + $0x18]] }
  0x2e   :  { %v243_v18 = vshll.u32 %v240_v8, 16  ;;  %v245_v19 = vshll.u32 %v241_v9, 16  ;;  %v244_v30 = vshrl.u32 %v240_v8, 16  ;;  %v246_v38 = vshrl.u32 %v241_v9, 16  ;;  %s1102_s0 = sld [smem:[#allocation2 + $0x1a]] }
  0x2f   :  { %vm269_vm6 = vc.u32 %v261_v14, %v265_v11  ;;  %v271_v29 = vadd.s32 %v265_v11, %v261_v14  ;;  %v151_v49 = vstv %s954_s30  ;;  %v225_v50 = vsel %vm219_vm4, %v222_v23, %v224_v33  ;;  %s1110_s25 = sld [smem:[#allocation2 + $0x1b]] }
  0x30   :  { %vm247_vm5 = vc.u32 %v239_v7, %v243_v18  ;;  %v249_v24 = vadd.s32 %v243_v18, %v239_v7  ;;  %v270_v35 = vsel %vm269_vm6, 1, %v829_v26  ;;  %v135_v52 = vadd.f32 %v134_v41, %v131_v1  ;;  %s1112_s26 = sld [smem:[#allocation2 + $0x1c]] }
  0x31   :  { %v248_v27 = vsel %vm247_vm5, 1, %v829_v26  ;;  %v272_v37 = vadd.s32 %v270_v35, %v264_v21  ;;  %vm273_vm8 = vc.u32 %v271_v29, %v267_v12  ;;  %v275_v48 = vadd.s32 %v271_v29, %v267_v12  ;;  %s1115_s1 = sld [smem:[#allocation2 + $0x1e]] }
  0x32   :  { %v250_v34 = vadd.s32 %v248_v27, %v242_v17  ;;  %vm251_vm7 = vc.u32 %v249_v24, %v245_v19  ;;  %v274_v40 = vsel %vm273_vm8, 1, %v829_v26  ;;  %v149_v53 = vmul.f32 %v148_v46, %v147_v5  ;;  %s1118_s2 = sld [smem:[#allocation2 + $0x19]] }
  0x33   :  { %v252_v36 = vsel %vm251_vm7, 1, %v829_v26  ;;  %v276_v44 = vadd.s32 %v274_v40, %v272_v37  ;;  %v144_v54 = vadd.f32 %v143_v45, %v140_v42  ;;  %v152_v55 = vmul.f32 %v151_v49, %v150_v13  ;;  %s1121_s27 = sld [smem:[#allocation2 + $0x1d]] }
  0x34   :  { %v254_v39 = vadd.s32 %v252_v36, %v250_v34  ;;  %v279_v57 = vmul.u32 %v887_v28, %v225_v50  ;;  %v136_v58 = vstv %s962_s4  ;;  %v145_v59 = vstv %s964_s5  ;;  %s654_s5 = sshll.u32 %s1150_s3, 4  ;;  %s655_s5 = int_to_ptr.hbm [resolvable:$true] %s654_s5 }
  0x35   :  { %v277_v51 = vadd.s32 %v276_v44, %v266_v31  ;;  %v976_v62 = vadd.f32 %v136_v58, %v135_v52  ;;  %v978_v63 = vadd.f32 %v145_v59, %v144_v54  ;;  %v153_v10 = vadd.f32 %v152_v55, %v149_v53  ;;  %v101_v58 = vld [vmem:[#allocation6 + $0x28] sm:$0xff]  ;;  %v103_v59 = vld [vmem:[#allocation6 + $0x30] sm:$0xff] }
  0x36   :  { %v255_v47 = vadd.s32 %v254_v39, %v244_v30  ;;  %v154_v4 = vstv %s676_s6  ;;  %vm329_vm7 = vweird.f32 %v866_v0 }
  0x37   :  { %v278_v56 = vadd.s32 %v277_v51, %v268_v43  ;;  %v980_v1 = vadd.f32 %v154_v4, %v153_v10  ;;  %v495_v7 = vmul.f32 %v976_v62, %v976_v62  ;;  %v496_v28 = vmul.f32 %v978_v63, %v978_v63 }
  0x38   :  { %v256_v32 = vadd.s32 %v255_v47, %v246_v38  ;;  %v995_v4 = vmul.f32 %v101_v58, %v101_v58 }
  0x39   :  { %v282_v60 = vadd.s32 1, %v278_v56  ;;  %v497_v13 = vadd.f32 %v496_v28, %v495_v7  ;;  %v498_v14 = vmul.f32 %v980_v1, %v980_v1  ;;  %v97_v28 = vld [vmem:[#allocation6 + $0x18] sm:$0xff] }
  0x3a   :  { %vm281_vm9 = vc.u32 %v256_v32, %v275_v48  ;;  %v280_v20 = vadd.s32 %v275_v48, %v256_v32 }
  0x3b   :  { %v283_v61 = vsel %vm281_vm9, %v282_v60, %v278_v56  ;;  %v499_v17 = vadd.f32 %v498_v14, %v497_v13 }
  0x3c   :  { %v284_v2 = vadd.s32 %v283_v61, %v279_v57 }
  0x3d   :  { %722 = vrsqrt.f32 %v499_v17  ;;  %vm506_vm14 = vweird.f32 %v499_v17 }
  0x3e   :  { %v285_v6 = vadd.s32 536870912, %v284_v2 }
  0x40   :  { %v286_v5 = vshrl.u32 %v285_v6, 30  ;;  %v157_v6 = vmul.f32 %v103_v59, %v103_v59 }
  0x42   :  { %v287_v8 = vshll.u32 %v286_v5, 30  ;;  %v310_v37 = vsub.s32 4, %v286_v5 }
  0x43   :  { %v723_v25 = vpop.eup %722 }
  0x44   :  { %v288_v9 = vsub.s32 %v284_v2, %v287_v8  ;;  %v501_v34 = vmul.f32 %v723_v25, %v499_v17  ;;  %v311_v40 = vsel %vm188_vm12, %v310_v37, %v286_v5  ;;  %vm507_vm15 = vweird.f32 %v723_v25  ;;  %v99_v2 = vld [vmem:[#allocation6 + $0x20] sm:$0xff] }
  0x45   :  { %v313_v43 = vsel %vm187_vm13, 0, %v311_v40  ;;  %vm508_vm0 = vmor %vm506_vm14, %vm507_vm15  ;;  %v997_v8 = vmul.f32 %v101_v58, %v99_v2  ;;  %v175_v37 = vmul.f32 %v103_v59, %v101_v58 }
  0x46   :  { %vm289_vm10 = vcmp.lt.s32.totalorder %v288_v9, 0  ;;  %v290_v15 = vsub.s32 0, %v288_v9  ;;  %v502_v31 = vmul.f32 %v723_v25, %v501_v34  ;;  %v484_v49 = vadd.s32 3, %v313_v43 }
  0x47   :  { %v330_v53 = vand.u32 3, %v313_v43 }
  0x48   :  { %v291_v16 = vsel %vm289_vm10, %v290_v15, %v288_v9  ;;  %v503_v39 = vmul.f32 0.5, %v502_v31  ;;  %v485_v56 = vand.u32 3, %v484_v49  ;;  %v166_v31 = vmul.f32 %v101_v58, %v97_v28 }
  0x49   :  { %v292_v18 = vclz %v291_v16  ;;  %vm335_vm1 = vcmp.eq.s32.totalorder %v330_v53, 2  ;;  %vm331_vm3 = vcmp.lt.s32.totalorder %v330_v53, 2  ;;  %vm332_vm4 = vcmp.eq.s32.totalorder %v330_v53, 0 }
  0x4a   :  { %v504_v46 = vsub.f32 1.5, %v503_v39  ;;  %vm490_vm2 = vcmp.eq.s32.totalorder %v485_v56, 2  ;;  %vm487_vm5 = vcmp.eq.s32.totalorder %v485_v56, 0  ;;  %vm486_vm6 = vcmp.lt.s32.totalorder %v485_v56, 2 }
  0x4b   :  { %v700_v19 = vadd.s32 4294967294, %v292_v18  ;;  %v158_v18 = vadd.f32 %v157_v6, %v995_v4 }
  0x4c   :  { %v505_v32 = vmul.f32 %v723_v25, %v504_v46 }
  0x4d   :  { %vm701_vm11 = vcmp.lt.s32.totalorder %v700_v19, 0 }
  0x4e   :  { %v295_v21 = vsel %vm701_vm11, 0, %v700_v19  ;;  %v509_v57 = vsel %vm508_vm0, %v723_v25, %v505_v32  ;;  %v162_v19 = vmul.f32 %v103_v59, %v97_v28 }
  0x4f   :  { %v296_v11 = vsub.s32 32, %v295_v21  ;;  %v297_v12 = vshll.u32 %v288_v9, %v295_v21  ;;  %v300_v22 = vsub.s32 4294967266, %v295_v21  ;;  %v993_v10 = vmul.f32 %v509_v57, %v980_v1 }
  0x50   :  { %v1001_v15 = vmul.f32 %v509_v57, %v976_v62  ;;  %v1004_v16 = vmul.f32 %v509_v57, %v978_v63 }
  0x51   :  { %v298_v23 = vshrl.u32 %v280_v20, %v296_v11  ;;  %v301_v24 = vadd.s32 127, %v300_v22  ;;  %v513_v17 = vsub.f32 0.0, %v993_v10 }
  0x53   :  { %v299_v26 = vor.u32 %v298_v23, %v297_v12  ;;  %v302_v27 = vshll.u32 %v301_v24, 23 }
  0x55   :  { %v303_v29 = vor.u32 4788187, %v302_v27  ;;  %v306_v30 = vcvt.s32.f32 %v299_v26  ;;  %v1023_v27 = vmul.f32 2.0, %v158_v18 }
  0x57   :  { %v304_v35 = vand.u32 2147483647, %v303_v29  ;;  %v169_v29 = vadd.f32 %v162_v19, %v997_v8  ;;  %v160_v40 = vsub.f32 1.0, %v1023_v27  ;;  %v111_v27 = vld [vmem:[#allocation6 + $0x50] sm:$0xff] }
  0x59   :  { %v307_v36 = vmul.f32 %v306_v30, %v304_v35  ;;  %v551_v49 = vmul.f32 %v1001_v15, %v160_v40 }
  0x5b   :  { %v308_v33 = vxor.u32 2147483648, %v307_v36 }
  0x5d   :  { %v309_v38 = vsel %vm188_vm12, %v308_v33, %v307_v36  ;;  %v165_v36 = vmul.f32 %v103_v59, %v99_v2  ;;  %v176_v33 = vmul.f32 %v99_v2, %v97_v28 }
  0x5e   :  { %v312_v41 = vsel %vm187_vm13, %v866_v0, %v309_v38 }
  0x5f   :  { %v314_v42 = vmul.f32 %v312_v41, %v312_v41  ;;  %v177_v46 = vsub.f32 %v175_v37, %v176_v33 }
  0x61   :  { %v315_v44 = vmul.f32 -0.001358992, %v314_v42  ;;  %v322_v45 = vmul.f32 -0.00019511016, %v314_v42 }
  0x63   :  { %v316_v47 = vadd.f32 0.041655596, %v315_v44  ;;  %v323_v48 = vadd.f32 0.008332121, %v322_v45  ;;  %v167_v44 = vadd.f32 %v166_v31, %v165_v36  ;;  %v171_v45 = vmul.f32 %v99_v2, %v99_v2 }
  0x65   :  { %v317_v50 = vmul.f32 %v316_v47, %v314_v42  ;;  %v324_v51 = vmul.f32 %v323_v48, %v314_v42  ;;  %v172_v32 = vadd.f32 %v171_v45, %v157_v6  ;;  %v183_v2 = vadd.f32 %v171_v45, %v995_v4 }
  0x67   :  { %v318_v3 = vadd.f32 -0.4999988, %v317_v50  ;;  %v325_v52 = vadd.f32 -0.16666654, %v324_v51  ;;  %v1044_v51 = vmul.f32 2.0, %v167_v44  ;;  %v173_v57 = vmul.f32 2.0, %v172_v32 }
  0x69   :  { %v319_v54 = vmul.f32 %v318_v3, %v314_v42  ;;  %v326_v55 = vmul.f32 %v325_v52, %v314_v42  ;;  %v179_v42 = vsub.f32 %v165_v36, %v166_v31  ;;  %v1046_v3 = vmul.f32 2.0, %v177_v46 }
  0x6a   :  { %v577_v36 = vstv %s1057_s8  ;;  %v579_v31 = vstv %s1064_s11 }
  0x6b   :  { %v320_v60 = vadd.f32 1.0, %v319_v54  ;;  %v327_v61 = vadd.f32 1.0, %v326_v55  ;;  %v1037_v48 = vmul.f32 2.0, %v179_v42  ;;  %v163_v55 = vsub.f32 %v997_v8, %v162_v19 }
  0x6d   :  { %v328_v5 = vmul.f32 %v327_v61, %v312_v41  ;;  %v336_v7 = vxor.u32 2147483648, %v320_v60  ;;  %v1035_v41 = vmul.f32 2.0, %v169_v29  ;;  %v554_v54 = vmul.f32 %v993_v10, %v1037_v48 }
  0x6e   :  { %v164_v6 = vmul.f32 2.0, %v163_v55 }
  0x6f   :  { %v333_v9 = vxor.u32 2147483648, %v328_v5  ;;  %v337_v13 = vsel %vm335_vm1, %v336_v7, %v328_v5  ;;  %v492_v14 = vsel %vm490_vm2, %v336_v7, %v328_v5  ;;  %v552_v50 = vmul.f32 %v1004_v16, %v1035_v41 }
  0x70   :  { %v174_v5 = vsub.f32 1.0, %v173_v57  ;;  %v181_v7 = vadd.f32 %v176_v33, %v175_v37  ;;  %v588_v33 = vmul.f32 %v1044_v51, %v976_v62  ;;  %v115_v62 = vld [vmem:[#allocation6 + $0x60] sm:$0xff]  ;;  %v595_v57 = vstv %s1070_s14 }
  0x71   :  { %v334_v20 = vsel %vm332_vm4, %v320_v60, %v333_v9  ;;  %v489_v21 = vsel %vm487_vm5, %v320_v60, %v333_v9  ;;  %v553_v56 = vadd.f32 %v552_v50, %v551_v49 }
  0x72   :  { %v338_v11 = vsel %vm331_vm3, %v334_v20, %v337_v13  ;;  %v493_v12 = vsel %vm486_vm6, %v489_v21, %v492_v14  ;;  %v184_v13 = vmul.f32 2.0, %v183_v2  ;;  %v182_v4 = vmul.f32 2.0, %v181_v7 }
  0x73   :  { %v1008_v22 = vsel %vm329_vm7, nan, %v338_v11  ;;  %v1010_v23 = vsel %vm329_vm7, nan, %v493_v12  ;;  %v555_v61 = vadd.f32 %v554_v54, %v553_v56  ;;  %v539_v18 = vmul.f32 %v1004_v16, %v174_v5 }
  0x74   :  { %v1013_v0 = vmul.f32 %v513_v17, %v1010_v23  ;;  %v1017_v24 = vmul.f32 %v993_v10, %v1008_v22  ;;  %v516_v25 = vmul.f32 %v1001_v15, %v1010_v23  ;;  %v517_v26 = vmul.f32 %v1004_v16, %v1008_v22 }
  0x75   :  { %v548_v52 = vmul.f32 %v1008_v22, %v1044_v51  ;;  %v549_v53 = vmul.f32 %v1010_v23, %v1046_v3  ;;  %v538_v17 = vmul.f32 %v1001_v15, %v164_v6  ;;  %v185_v21 = vsub.f32 1.0, %v184_v13 }
  0x76   :  { %v1026_v30 = vsub.f32 %v516_v25, %v517_v26  ;;  %v519_v34 = vmul.f32 %v1013_v0, %v1013_v0  ;;  %v520_v35 = vmul.f32 %v1017_v24, %v1017_v24  ;;  %v541_v15 = vmul.f32 %v993_v10, %v182_v4  ;;  %v113_v10 = vld [vmem:[#allocation6 + $0x58] sm:$0xff] }
  0x77   :  { %v550_v60 = vadd.f32 %v549_v53, %v548_v52  ;;  %v540_v12 = vadd.f32 %v539_v18, %v538_v17  ;;  %v561_v16 = vmul.f32 %v1008_v22, %v164_v6  ;;  %v580_v45 = vmul.f32 %v579_v31, %v113_v10 }
  0x78   :  { %v521_v38 = vadd.f32 %v520_v35, %v519_v34  ;;  %v522_v39 = vmul.f32 %v1026_v30, %v1026_v30  ;;  %v562_v34 = vmul.f32 %v1010_v23, %v174_v5  ;;  %v591_v49 = vmul.f32 %v185_v21, %v980_v1 }
  0x79   :  { %v566_v9 = vsub.f32 %v550_v60, %v555_v61  ;;  %v593_v54 = vstv %s1068_s13  ;;  %v606_v1 = vstv %s1078_s17  ;;  %v598_v61 = vstv %s1072_s15 }
  0x7a   :  { %v523_v43 = vadd.f32 %v522_v39, %v521_v38  ;;  %v589_v38 = vmul.f32 %v1046_v3, %v978_v63  ;;  %v542_v39 = vadd.f32 %v541_v15, %v540_v12  ;;  %v585_v63 = vstv %s1066_s12 }
  0x7b   :  { %v567_v20 = vmul.f32 0.5, %v566_v9  ;;  %v586_v56 = vmul.f32 %v585_v63, %v115_v62  ;;  %v620_v2 = vstv %s1092_s23  ;;  %v601_v5 = vstv %s1076_s16 }
  0x7c   :  { %v524_v47 = vmax.f32 %v523_v43, 1e-24  ;;  %v563_v43 = vadd.f32 %v562_v34, %v561_v16  ;;  %v611_v7 = vstv %s1082_s19  ;;  %v634_v13 = vstv %s1110_s25 }
  0x7d   :  { %v576_v35 = vsub.f32 0.0, %v567_v20  ;;  %v636_v4 = vstv %s1112_s26  ;;  %v614_v17 = vstv %s1086_s20  ;;  %v628_v18 = vstv %s1102_s0 }
  0x7e   :  { %724 = vrsqrt.f32 %v524_v47  ;;  %vm531_vm8 = vweird.f32 %v524_v47  ;;  %v625_v16 = vstv %s1118_s2 }
  0x7f   :  { %v578_v44 = vmul.f32 %v577_v36, %v576_v35 }
  0x81   :  { %v581_v53 = vsub.f32 %v578_v44, %v580_v45 }
  0x83   :  { %v596_v9 = vmul.f32 %v595_v57, %v581_v53 }
  0x84   :  { %v725_v58 = vpop.eup %724 }
  0x85   :  { %v526_v59 = vmul.f32 %v725_v58, %v524_v47  ;;  %vm532_vm9 = vweird.f32 %v725_v58 }
  0x86   :  { %vm533_vm10 = vmor %vm531_vm8, %vm532_vm9 }
  0x87   :  { %v527_v28 = vmul.f32 %v725_v58, %v526_v59 }
  0x89   :  { %v528_v8 = vmul.f32 0.5, %v527_v28  ;;  %v622_v28 = vstv %s1096_s24 }
  0x8a   :  { %v623_v12 = vmul.f32 %v622_v28, %v581_v53 }
  0x8b   :  { %v529_v14 = vsub.f32 1.5, %v528_v8 }
  0x8d   :  { %v530_v19 = vmul.f32 %v725_v58, %v529_v14 }
  0x8f   :  { %v534_v11 = vsel %vm533_vm10, %v725_v58, %v530_v19  ;;  %v608_v58 = vstv %s1080_s18  ;;  %v642_v19 = vstv %s1115_s1 }
  0x90   :  { %v535_v25 = vmul.f32 %v534_v11, %v1013_v0  ;;  %v536_v26 = vmul.f32 %v534_v11, %v1017_v24  ;;  %v537_v29 = vmul.f32 %v534_v11, %v1026_v30  ;;  %v609_v11 = vmul.f32 %v608_v58, %v581_v53 }
  0x92   :  { %v543_v22 = vmul.f32 %v535_v25, %v1044_v51  ;;  %v544_v37 = vmul.f32 %v536_v26, %v1046_v3  ;;  %v546_v0 = vmul.f32 %v537_v29, %v185_v21  ;;  %v556_v24 = vmul.f32 %v535_v25, %v160_v40 }
  0x93   :  { %v557_v23 = vmul.f32 %v536_v26, %v1035_v41  ;;  %v559_v30 = vmul.f32 %v537_v29, %v1037_v48  ;;  %v573_v41 = vstv %s1061_s10  ;;  %v590_v48 = vadd.f32 %v589_v38, %v588_v33 }
  0x94   :  { %v545_v42 = vadd.f32 %v544_v37, %v543_v22  ;;  %v571_v51 = vstv %s1054_s7  ;;  %v574_v32 = vmul.f32 %v573_v41, %v111_v27  ;;  %v583_v3 = vstv %s1059_s9 }
  0x95   :  { %v558_v40 = vadd.f32 %v557_v23, %v556_v24  ;;  %v592_v60 = vadd.f32 %v591_v49, %v590_v48  ;;  %v637_v25 = vmul.f32 %v636_v4, %v581_v53  ;;  %v639_v26 = vstv %s1121_s27 }
  0x96   :  { %v547_v46 = vadd.f32 %v546_v0, %v545_v42 }
  0x97   :  { %v560_v47 = vadd.f32 %v559_v30, %v558_v40  ;;  %v602_v21 = vmul.f32 %v601_v5, %v592_v60  ;;  %v615_v34 = vmul.f32 %v614_v17, %v592_v60  ;;  %v629_v35 = vmul.f32 %v628_v18, %v592_v60 }
  0x98   :  { %v564_v50 = vsub.f32 %v542_v39, %v547_v46  ;;  %v643_v36 = vmul.f32 %v642_v19, %v592_v60 }
  0x99   :  { %v568_v52 = vsub.f32 %v560_v47, %v563_v43 }
  0x9a   :  { %v565_v55 = vmul.f32 0.5, %v564_v50 }
  0x9b   :  { %v569_v59 = vmul.f32 0.5, %v568_v52 }
  0x9c   :  { %v570_v6 = vsub.f32 0.0, %v565_v55 }
  0x9d   :  { %v582_v8 = vsub.f32 0.0, %v569_v59 }
  0x9e   :  { %v572_v14 = vmul.f32 %v571_v51, %v570_v6 }
  0x9f   :  { %v584_v20 = vmul.f32 %v583_v3, %v582_v8 }
  0xa0   :  { %v575_v15 = vsub.f32 %v572_v14, %v574_v32 }
  0xa1   :  { %v587_v29 = vsub.f32 %v584_v20, %v586_v56 }
  0xa2   :  { %v594_v31 = vmul.f32 %v593_v54, %v575_v15  ;;  %v607_v10 = vmul.f32 %v606_v1, %v575_v15  ;;  %v621_v22 = vmul.f32 %v620_v2, %v575_v15  ;;  %v635_v37 = vmul.f32 %v634_v13, %v575_v15 }
  0xa3   :  { %v599_v0 = vmul.f32 %v598_v61, %v587_v29  ;;  %v612_v24 = vmul.f32 %v611_v7, %v587_v29  ;;  %v626_v23 = vmul.f32 %v625_v16, %v587_v29  ;;  %v640_v30 = vmul.f32 %v639_v26, %v587_v29 }
  0xa4   :  { %v597_v33 = vadd.f32 %v596_v9, %v594_v31  ;;  %v610_v38 = vadd.f32 %v609_v11, %v607_v10  ;;  %v624_v39 = vadd.f32 %v623_v12, %v621_v22  ;;  %v638_v42 = vadd.f32 %v637_v25, %v635_v37 }
  0xa6   :  { %v600_v43 = vadd.f32 %v599_v0, %v597_v33  ;;  %v613_v27 = vadd.f32 %v612_v24, %v610_v38  ;;  %v627_v40 = vadd.f32 %v626_v23, %v624_v39  ;;  %v641_v41 = vadd.f32 %v640_v30, %v638_v42 }
  0xa8   :  { %v603_v44 = vadd.f32 %v602_v21, %v600_v43  ;;  %v616_v45 = vadd.f32 %v615_v34, %v613_v27  ;;  %v630_v62 = vadd.f32 %v629_v35, %v627_v40  ;;  %v644_v46 = vadd.f32 %v643_v36, %v641_v41 }
  0xaa   :  { %v705_v63 = vadd.f32 -1.0, %v603_v44  ;;  %v706_v47 = vadd.f32 -1.0, %v616_v45  ;;  %v707_v48 = vadd.f32 -1.0, %v630_v62  ;;  %v708_v49 = vadd.f32 -1.0, %v644_v46 }
  0xac   :  { %605 = vst [vmem:[#allocation9] sm:$0xff] %v705_v63 }
  0xad   :  { %619 = vst [vmem:[#allocation9 + $0x8] sm:$0xff] %v706_v47 }
  0xae   :  { %633 = vst [vmem:[#allocation9 + $0x10] sm:$0xff] %v707_v48 }
  0xaf   :  { %647 = vst [vmem:[#allocation9 + $0x18] sm:$0xff] %v708_v49 }
  0xb0   :  { %660 = dma.vmem_to_hbm [thread:$0]  %s653_s29, 512, %s655_s5, [#allocation4], %s820_s21, %s820_s21, %s821_s22  }
  0xb1   :  { %816 = dma.done.wait [#allocation4], 512  }
  0xb2   :  { %817 = vsyncadd [#allocation4], 4294966784 }
  0xb3   :  { %665 = vsyncpa [#allocation3], 1 }
  0xb4   :  { %666 = vsyncpa [#allocation8], 1 }
  0xb5   :  { %667 = vsyncpa [#allocation4], 1 }
  0xb6   :  { %668 = vsyncpa [#allocation5], 1 }

</bundles_post_ra>
